<compile_context>
chip_gen: v7x
topology: tpu7x:2x2x1
jax: 0.10.0
libtpu: 0.0.40
codegen_flags: <defaults>
</compile_context>

<pallas_src>
import math

import jax
import jax.numpy as jnp
from jax import lax
from jax.experimental import pallas as pl
from jax.experimental.pallas import tpu as pltpu

_MIB = 1024 * 1024


def contextual_embeddings_kernel(kbd_ref, x_ref, bias_ref, out_ref):
    """out[b, :] = x[b, :] @ Kbd + bias_row  -> one dense (TB, F*D) store."""
    acc = jnp.dot(
        x_ref[...].astype(jnp.float32),          # (TB, F)   mirrors .float()
        kbd_ref[...].astype(jnp.float32),        # (F, F*D)  block-diagonal key
        preferred_element_type=jnp.float32,
        precision=lax.Precision.HIGHEST,         # bit-close to elementwise f32
    )
    out_ref[...] = (acc + bias_ref[...].astype(jnp.float32)).astype(out_ref.dtype)


def _vmem_capacity_bytes() -> int:
    try:
        return int(pltpu.get_tpu_info().vmem_capacity_bytes)
    except Exception:
        return 64 * _MIB  # conservative fallback: assume smallest (v7x-class) VMEM


def _choose_batch_tile(batch: int, row_bytes: int, target_tile_bytes: int,
                       min_steps: int = 4) -> int:
    """Batch tile: ~target_tile_bytes output slab, multiple of 8 (or full batch).

    Capped so the grid has >= min_steps steps whenever the batch is large
    enough: with a single grid step one v7x TC idles and the output writeback
    is fully exposed instead of pipelined under compute/fetch.
    """
    tb = max(8, (target_tile_bytes // max(row_bytes, 1)) // 8 * 8)
    if tb >= batch:
        tb = batch
    steps = min(min_steps, batch // 8)           # each step needs >= 8 rows
    if steps >= 2:
        cap = -(-batch // steps)                 # cdiv(batch, steps)
        cap = -(-cap // 8) * 8                   # round up to a multiple of 8
        tb = min(tb, cap)
    return tb


def contextual_embeddings(feat_key_embds: jax.Array,
                          x: jax.Array,
                          bias: jax.Array,
                          *,
                          block_batch: int | None = None,
                          out_dtype=jnp.float32) -> jax.Array:
    """Pallas forward. feat_key_embds: (F, D), x: (B, F), bias: (1, 1, D)."""
    assert x.ndim == 2
    n_features, d_embedding = feat_key_embds.shape
    assert n_features == x.shape[-1]
    assert bias.shape[-1] == d_embedding
    batch = x.shape[0]
    flat_width = n_features * d_embedding

    # Block-diagonal key: kbd[f, f*D + d] = key[f, d] iff f' == f, else 0.
    # Lets the MXU do the per-feature scale + lane replication in one pass.
    # TODO(synk): for very large n_features, add a feature grid axis with a
    # per-tile block-diagonal key (Ft, Ft*D) to avoid the O(F^2*D) kbd.
    eye = jnp.eye(n_features, dtype=jnp.float32)
    kbd = (eye[:, :, None] * feat_key_embds.astype(jnp.float32)[None, :, :]
           ).reshape(n_features, flat_width)
    bias_row = jnp.tile(bias.reshape(1, d_embedding).astype(jnp.float32),
                        (1, n_features))          # (1, F*D): bias_row[0,f*D+d]=bias[d]

    out_itemsize = jnp.dtype(out_dtype).itemsize
    row_bytes = flat_width * out_itemsize

    # Generation-aware tiling: v7x has ~64 MiB VMEM but ~3.2 TB/s HBM -> bigger
    # tiles (amortize per-step overhead) within a tighter VMEM budget.
    vmem_cap = _vmem_capacity_bytes()
    if vmem_cap <= 64 * _MIB:                     # v7x-class
        target_tile_bytes, vmem_limit = 12 * _MIB, 40 * _MIB
    else:                                         # v5e / v6e (128 MiB VMEM)
        target_tile_bytes, vmem_limit = 8 * _MIB, 32 * _MIB

    tb = (block_batch if block_batch is not None
          else _choose_batch_tile(batch, row_bytes, target_tile_bytes))
    assert tb == batch or tb % 8 == 0, (
        "batch tile must be full-extent or a multiple of 8")
    grid = (pl.cdiv(batch, tb),)

    cost = pl.CostEstimate(
        flops=2 * batch * n_features * flat_width,
        transcendentals=0,
        bytes_accessed=(out_itemsize * batch * flat_width
                        + 4 * (batch * n_features
                               + n_features * flat_width
                               + flat_width)),
    )

    out_flat = pl.pallas_call(
        contextual_embeddings_kernel,
        out_shape=jax.ShapeDtypeStruct((batch, flat_width), out_dtype),
        grid=grid,
        in_specs=[
            # kbd / bias: constant index_map -> stay resident in VMEM.
            pl.BlockSpec((n_features, flat_width), lambda i: (0, 0)),
            # x streams with the batch grid axis.
            pl.BlockSpec((tb, n_features), lambda i: (i, 0)),
            pl.BlockSpec((1, flat_width), lambda i: (0, 0)),
        ],
        # Lane-dense output: whole F*D row on the lane axis, one unmasked store.
        out_specs=pl.BlockSpec((tb, flat_width), lambda i: (i, 0)),
        compiler_params=pltpu.CompilerParams(
            dimension_semantics=("parallel",),    # shard batch tiles across TCs
            vmem_limit_bytes=vmem_limit,
        ),
        cost_estimate=cost,
    )(kbd, x, bias_row)

    # (B, F*D) is row-major identical to (B, F, D): free reshape outside.
    return out_flat.reshape(batch, n_features, d_embedding)


if __name__ == "__main__":
    d_embedding = 64
    n_features = 8

    key0 = jax.random.PRNGKey(0)
    k_bias, k_feat, k_x1, k_x2, k_x3 = jax.random.split(key0, 5)

    # Deterministic parameter init matching nn.init.uniform_(-1/sqrt(D), 1/sqrt(D)).
    bound = 1.0 / math.sqrt(d_embedding)
    bias = jax.random.uniform(
        k_bias, (1, 1, d_embedding), jnp.float32, minval=-bound, maxval=bound)
    feat_key_embds = jax.random.normal(
        k_feat, (n_features, d_embedding), jnp.float32)

    def reference(fk, xx, bb):
        return fk[None, :, :] * xx.astype(jnp.float32)[:, :, None] + bb

    # Case 1: module-default tiny shapes (single grid step, full-extent blocks).
    x1 = jax.random.normal(k_x1, (2, n_features), jnp.float32)
    out1 = jax.block_until_ready(contextual_embeddings(feat_key_embds, x1, bias))
    assert out1.shape == (2, n_features, d_embedding)
    assert out1.dtype == jnp.float32
    assert jnp.allclose(out1, reference(feat_key_embds, x1, bias),
                        atol=1e-5, rtol=1e-5)

    # Case 2: explicit small tile -> pipelined batch grid + partial tail block.
    x2 = jax.random.normal(k_x2, (20, n_features), jnp.float32)
    out2 = jax.block_until_ready(
        contextual_embeddings(feat_key_embds, x2, bias, block_batch=8))
    assert out2.shape == (20, n_features, d_embedding)
    assert jnp.allclose(out2, reference(feat_key_embds, x2, bias),
                        atol=1e-5, rtol=1e-5)

    # Case 3: automatic tile selection (min-steps cap -> multi-step grid).
    x3 = jax.random.normal(k_x3, (128, n_features), jnp.float32)
    out3 = jax.block_until_ready(contextual_embeddings(feat_key_embds, x3, bias))
    assert out3.shape == (128, n_features, d_embedding)
    assert jnp.allclose(out3, reference(feat_key_embds, x3, bias),
                        atol=1e-5, rtol=1e-5)

    print("KERNEL_OK")
</pallas_src>

<mosaic_0001>
module attributes {stable_mosaic.version = 11 : i64} {
  func.func @contextual_embeddings_kernel(%arg0: i32, %arg1: memref<8x512xf32, #tpu.memory_space<vmem>>, %arg2: memref<2x8xf32, #tpu.memory_space<vmem>>, %arg3: memref<1x512xf32, #tpu.memory_space<vmem>>, %arg4: memref<2x512xf32, #tpu.memory_space<vmem>>) attributes {dimension_semantics = [#tpu.dimension_semantics<parallel>], iteration_bounds = array<i64: 1>, scalar_prefetch = 0 : i64, scratch_operands = 0 : i64, tpu.core_type = #tpu.core_type<tc>, window_params = [{pipeline_mode = #tpu.pipeline_mode<synchronous>, transform_indices = @transform_0, window_bounds = array<i64: 8, 512>}, {transform_indices = @transform_1, window_bounds = array<i64: 2, 8>}, {pipeline_mode = #tpu.pipeline_mode<synchronous>, transform_indices = @transform_2, window_bounds = array<i64: 1, 512>}, {transform_indices = @transform_3, window_bounds = array<i64: 2, 512>}]} {
    %c0 = arith.constant 0 : index
    %c0_0 = arith.constant 0 : index
    %0 = vector.load %arg2[%c0, %c0_0] : memref<2x8xf32, #tpu.memory_space<vmem>>, vector<2x8xf32>
    %c0_1 = arith.constant 0 : index
    %c0_2 = arith.constant 0 : index
    %1 = vector.load %arg1[%c0_1, %c0_2] : memref<8x512xf32, #tpu.memory_space<vmem>>, vector<8x512xf32>
    %cst = arith.constant dense<0.000000e+00> : vector<2x512xf32>
    %2 = tpu.matmul %0, %1, %cst {dimension_numbers = #tpu.dot_dimension_numbers<[1], [0], [0], [1], [0, 0, 1, 1], [], []>, precision = #tpu.contract_precision<fp32>} : vector<2x8xf32>, vector<8x512xf32>, vector<2x512xf32> -> vector<2x512xf32>
    %c0_3 = arith.constant 0 : index
    %c0_4 = arith.constant 0 : index
    %3 = vector.load %arg3[%c0_3, %c0_4] : memref<1x512xf32, #tpu.memory_space<vmem>>, vector<1x512xf32>
    %4 = vector.broadcast %3 : vector<1x512xf32> to vector<2x512xf32>
    %5 = arith.addf %2, %4 : vector<2x512xf32>
    %c0_5 = arith.constant 0 : index
    %c0_6 = arith.constant 0 : index
    %6 = vector.load %arg4[%c0_5, %c0_6] : memref<2x512xf32, #tpu.memory_space<vmem>>, vector<2x512xf32>
    tpu.vector_store %arg4[%c0_5, %c0_6], %5 {strides = array<i32>} : memref<2x512xf32, #tpu.memory_space<vmem>>, vector<2x512xf32>,
    return
  }
  func.func @transform_0(%arg0: i32) -> (i32, i32) {
    %c0_i32 = arith.constant 0 : i32
    %c0_i32_0 = arith.constant 0 : i32
    %c0_i32_1 = arith.constant 0 : i32
    return %c0_i32, %c0_i32_0 : i32, i32
  }
  func.func @transform_1(%arg0: i32) -> (i32, i32) {
    %c0_i32 = arith.constant 0 : i32
    %c0_i32_0 = arith.constant 0 : i32
    return %arg0, %c0_i32 : i32, i32
  }
  func.func @transform_2(%arg0: i32) -> (i32, i32) {
    %c0_i32 = arith.constant 0 : i32
    %c0_i32_0 = arith.constant 0 : i32
    %c0_i32_1 = arith.constant 0 : i32
    return %c0_i32, %c0_i32_0 : i32, i32
  }
  func.func @transform_3(%arg0: i32) -> (i32, i32) {
    %c0_i32 = arith.constant 0 : i32
    %c0_i32_0 = arith.constant 0 : i32
    return %arg0, %c0_i32 : i32, i32
  }
}

</mosaic_0001>

<bundles_post_ra>
// kernel: tpu_custom_call.1
= control target key start
LH: loop header
LB: loop body
LE: loop exit
PB: predicated region body
PF: predicated region fallthrough
CT: control target
= control target key end

     0   :  { %8 = vsyncpa [#allocation3], 0  ;;  %s1186_s0 = inlined_call_operand.hbm [shape: f32[8,512], index: 0, kind: input, shape index: {}]   ;;  %s1187_s1 = inlined_call_operand.vmem [shape: f32[2,8], index: 1, kind: input, shape index: {}]   ;;  %s1188_s2 = inlined_call_operand.vmem [shape: f32[1,512], index: 2, kind: input, shape index: {}]   ;;  %s1189_s3 = inlined_call_operand.hbm [shape: f32[2,512], index: 3, kind: output, shape index: {}]  }
   0x1   :  { %9 = vsyncpa [#allocation4], 0  ;;  %s1102_s12 = smov [#allocation2]   ;;  %s1054_s16 = scalar_lea.hbm %s1186_s0, 512 }
   0x2   :  { %s16_s13 = sshll.u32 %s1102_s12, 4  ;;  %p1055_p0 = scmp.ne.s32.totalorder %s1186_s0, %s1054_s16  ;;  %s17_s13 = int_to_ptr.vmem [resolvable:$true] %s16_s13 }
   0x3   :  { %p1058_p1 = scmp.lt.u32.totalorder %s1054_s16, %s1186_s0 }
   0x5   :  { %p1060_p2 = pnand %p1058_p1, %p1055_p0 }
   0x7   :  { %1063 = shalt.err (!%p1060_p2)
}
   0x8   :  { %s1064_s21 = scalar_lea.vmem %s17_s13, 512  ;;  %p1069_p4 = scmp.lt.s32.totalorder %s17_s13, %s17_s13 }
   0x9   :  { %p1065_p3 = scmp.ne.s32.totalorder %s17_s13, %s1064_s21  ;;  %p1070_p5 = scmp.lt.s32.totalorder %s1064_s21, %s1064_s21 }
   0xb   :  { %p1071_p6 = por %p1070_p5, %p1069_p4 }
   0xd   :  { %p1072_p7 = pnand %p1071_p6, %p1065_p3 }
   0xf   :  { %1075 = shalt.err (!%p1072_p7)
}
  0x10   :  { %19 = dma.hbm_to_vmem [thread:$0]  %s1186_s0, 512, %s17_s13, [#allocation3]  }
  0x11   :  { %1098 = dma.done.wait [#allocation3], 512  }
  0x12   :  { %1099 = vsyncadd [#allocation3], 4294966784  ;;  %v1103_v0 = vmov 0.0   ;;  %vm54_vm0 = vcmask 64512   ;;  %v29_v1 = vld [vmem:[#allocation2 + $0x8] sm:$0xff]  ;;  %v31_v2 = vld [vmem:[#allocation2 + $0x18] sm:$0xff]  ;;  %v34_v32 = vlaneseq }
  0x13   :  { %124 = vmatprep.mubr.f32.mxu0 %v1103_v0  ;;  %589 = vmatprep.mubr.f32.mxu1 %v1103_v0  ;;  %v28_v3 = vld [vmem:[#allocation2] sm:$0xff]  ;;  %v58_v4 = vand.u32 4294901760, %v29_v1  ;;  %v1140_v5 = vand.u32 4294901760, %v31_v2  ;;  %v30_v7 = vld [vmem:[#allocation2 + $0x10] sm:$0xff]  ;;  %v1104_v38 = vmov 1983009808  }
  0x14   :  { %v1142_v6 = vand.u32 4294901760, %v28_v3  ;;  %v27_v8 = vld [vmem:[%s1187_s1] sm:$0x3]  ;;  %v1147_v9 = vand.u32 4294901760, %v30_v7  ;;  %v35_v33 = vshrl.u32 %v34_v32, 7  ;;  %v995_v39 = vunpack.c.l.s4 %v1104_v38 }
  0x15   :  { %v56_v10 = vsel %vm54_vm0, %v27_v8, 0  ;;  %59 = vmatprep.subr.mxu0 %v58_v4  ;;  %524 = vmatprep.subr.mxu1 %v1140_v5  ;;  %v137_v12 = vsub.f32 %v29_v1, %v58_v4  ;;  %v602_v13 = vsub.f32 %v31_v2, %v1140_v5  ;;  %v32_v36 = vld [vmem:[%s1188_s2] sm:$0xf]  ;;  %s1105_s2 = smov [#allocation5]  }
  0x16   :  { %v143_v11 = vsub.f32 %v28_v3, %v1142_v6  ;;  %v125_v14 = vand.u32 4294901760, %v56_v10  ;;  %61 = vmatpush1.msra.mxu0 %v1142_v6  ;;  %526 = vmatpush1.msra.mxu1 %v1147_v9  ;;  %v608_v15 = vsub.f32 %v30_v7, %v1147_v9  ;;  %v36_v34 = vsub.s32 0, %v35_v33  ;;  %s1017_s26 = sshll.u32 %s1105_s2, 4  ;;  %s1018_s26 = int_to_ptr.vmem [resolvable:$true] %s1017_s26 }
  0x17   :  { %v138_v16 = vand.u32 4294901760, %v137_v12  ;;  %v603_v17 = vand.u32 4294901760, %v602_v13  ;;  %v44_v35 = vsub.s32 2, %v35_v33  ;;  %v40_v37 = vsub.s32 1, %v35_v33  ;;  %s1076_s27 = scalar_lea.vmem %s1018_s26, 128  ;;  %p1081_p9 = scmp.lt.s32.totalorder %s1018_s26, %s1018_s26 }
  0x18   :  { %v126_v18 = vsub.f32 %v56_v10, %v125_v14  ;;  %v144_v19 = vand.u32 4294901760, %v143_v11  ;;  %v609_v20 = vand.u32 4294901760, %v608_v15  ;;  %v48_v40 = vsub.s32 3, %v35_v33  ;;  %p1077_p8 = scmp.ne.s32.totalorder %s1018_s26, %s1076_s27  ;;  %p1082_p10 = scmp.lt.s32.totalorder %s1076_s27, %s1076_s27 }
  0x19   :  { %v139_v21 = vsub.f32 %v137_v12, %v138_v16  ;;  %v604_v22 = vsub.f32 %v602_v13, %v603_v17  ;;  %v37_v41 = vrot.slane %v32_v36, %v36_v34  ;;  %v45_v42 = vrot.slane %v32_v36, %v44_v35 }
  0x1a   :  { %v127_v23 = vand.u32 4294901760, %v126_v18  ;;  %v145_v24 = vsub.f32 %v143_v11, %v144_v19  ;;  %v610_v25 = vsub.f32 %v608_v15, %v609_v20  ;;  %v41_v43 = vrot.slane %v32_v36, %v40_v37  ;;  %p1083_p11 = por %p1082_p10, %p1081_p9 }
  0x1b   :  { %v140_v26 = vand.u32 4294901760, %v139_v21  ;;  %v605_v27 = vand.u32 4294901760, %v604_v22  ;;  %v996_v44 = vunpack.c.0.s8 %v995_v39  ;;  %v49_v45 = vrot.slane %v32_v36, %v48_v40 }
  0x1c   :  { %v128_v28 = vsub.f32 %v126_v18, %v127_v23  ;;  %v146_v29 = vand.u32 4294901760, %v145_v24  ;;  %v611_v30 = vand.u32 4294901760, %v610_v25  ;;  %p1084_p12 = pnand %p1083_p11, %p1077_p8 }
  0x1d   :  { %141 = vmatprep.subr.mxu0 %v140_v26  ;;  %606 = vmatprep.subr.mxu1 %v605_v27  ;;  %v999_v53 = vsub.s32 %v996_v44, %v35_v33 }
  0x1e   :  { %v129_v31 = vand.u32 4294901760, %v128_v28 }
  0x20   :  { %130 = vmatmul.mubr.f32.vlgmr.msra.gmra.mrb[0].mxu0 %v129_v31  ;;  %595 = vmatmul.mubr.f32.vlgmr.msra.gmra.mrb[0].mxu1 %v129_v31 }
  0x21   :  { %147 = vmatpush1.msra.mxu0 %v146_v29  ;;  %612 = vmatpush1.msra.mxu1 %v611_v30 }
  0x22   :  { %210 = vmatprep.mubr.f32.mxu0 %v1103_v0  ;;  %220 = vmatprep.subr.mxu0 %v137_v12 }
  0x23   :  { %675 = vmatprep.mubr.f32.mxu1 %v1103_v0  ;;  %685 = vmatprep.subr.mxu1 %v602_v13 }
  0x28   :  { %212 = vmatmul.mubr.f32.vlgmr.msra.gmra.mrb[0].mxu0 %v125_v14  ;;  %677 = vmatmul.mubr.f32.vlgmr.msra.gmra.mrb[0].mxu1 %v125_v14 }
  0x29   :  { %223 = vmatpush1.msra.mxu0 %v143_v11  ;;  %688 = vmatpush1.msra.mxu1 %v608_v15 }
  0x2a   :  { %286 = vmatprep.mubr.f32.mxu0 %v1103_v0  ;;  %296 = vmatprep.subr.mxu0 %v58_v4 }
  0x2b   :  { %751 = vmatprep.mubr.f32.mxu1 %v1103_v0  ;;  %761 = vmatprep.subr.mxu1 %v1140_v5 }
  0x30   :  { %289 = vmatmul.mubr.f32.vlgmr.msra.gmra.mrb[0].mxu0 %v126_v18  ;;  %754 = vmatmul.mubr.f32.vlgmr.msra.gmra.mrb[0].mxu1 %v126_v18 }
  0x31   :  { %298 = vmatpush1.msra.mxu0 %v1142_v6  ;;  %763 = vmatpush1.msra.mxu1 %v1147_v9 }
  0x32   :  { %361 = vmatprep.mubr.f32.mxu0 %v1103_v0  ;;  %374 = vmatprep.subr.mxu0 %v138_v16 }
  0x33   :  { %826 = vmatprep.mubr.f32.mxu1 %v1103_v0  ;;  %839 = vmatprep.subr.mxu1 %v603_v17 }
  0x38   :  { %365 = vmatmul.mubr.f32.vlgmr.msra.gmra.mrb[0].mxu0 %v127_v23  ;;  %830 = vmatmul.mubr.f32.vlgmr.msra.gmra.mrb[0].mxu1 %v127_v23 }
  0x39   :  { %378 = vmatpush1.msra.mxu0 %v144_v19  ;;  %843 = vmatpush1.msra.mxu1 %v609_v20 }
  0x3a   :  { %441 = vmatprep.mubr.f32.mxu0 %v1103_v0  ;;  %450 = vmatprep.subr.mxu0 %v58_v4 }
  0x3b   :  { %906 = vmatprep.mubr.f32.mxu1 %v1103_v0  ;;  %915 = vmatprep.subr.mxu1 %v1140_v5 }
  0x40   :  { %443 = vmatmul.mubr.f32.vlgmr.msra.gmra.mrb[0].mxu0 %v125_v14  ;;  %908 = vmatmul.mubr.f32.vlgmr.msra.gmra.mrb[0].mxu1 %v125_v14 }
  0x41   :  { %452 = vmatpush1.msra.mxu0 %v1142_v6  ;;  %917 = vmatpush1.msra.mxu1 %v1147_v9 }
  0x42   :  { %515 = vmatprep.mubr.f32.mxu0 %v1103_v0  ;;  %980 = vmatprep.mubr.f32.mxu1 %v1103_v0 }
  0x48   :  { %517 = vmatmul.mubr.f32.vlgmr.msra.gmra.mrb[0].mxu0 %v125_v14  ;;  %982 = vmatmul.mubr.f32.vlgmr.msra.gmra.mrb[0].mxu1 %v125_v14 }
 0x11b   :  { %v518_v46 = vpop.f32.mrb[0].mxu0  ;;  %v983_v47 = vpop.f32.mrb[0].mxu1 }
 0x11c   :  { %v1026_v48 = vadd.f32 %v518_v46, %v37_v41  ;;  %v1028_v49 = vadd.f32 %v983_v47, %v45_v42  ;;  %v520_v50 = vpop.f32.mrb[1].mxu0  ;;  %v985_v51 = vpop.f32.mrb[1].mxu1 }
 0x11d   :  { %v1027_v52 = vadd.f32 %v520_v50, %v41_v43  ;;  %v1029_v54 = vadd.f32 %v985_v51, %v49_v45 }
 0x11f   :  { %v992_v55 = vcombine.low %v1026_v48, %v1027_v52  ;;  %v993_v56 = vcombine.low %v1028_v49, %v1029_v54 }
 0x121   :  { %v1000_v57 = vrot.slane %v992_v55, %v999_v53  ;;  %v1007_v58 = vrot.slane %v993_v56, %v999_v53 }
 0x123   :  { %v1008_v59 = vcombine.low %v1000_v57, %v1007_v58 }
 0x125   :  { %1010 = vst [vmem:[#allocation5] sm:$0xff] %v1008_v59 }
 0x126   :  { %1087 = shalt.err (!%p1084_p12)
}
 0x127   :  { %s1088_s30 = scalar_lea.hbm %s1189_s3, 128 }
 0x128   :  { %p1089_p13 = scmp.ne.s32.totalorder %s1189_s3, %s1088_s30  ;;  %p1092_p0 = scmp.lt.u32.totalorder %s1088_s30, %s1189_s3 }
 0x12a   :  { %p1094_p1 = pnand %p1092_p0, %p1089_p13 }
 0x12c   :  { %1097 = shalt.err (!%p1094_p1)
}
 0x12d   :  { %1020 = dma.vmem_to_hbm [thread:$0]  %s1018_s26, 128, %s1189_s3, [#allocation4]  }
 0x12e   :  { %1100 = dma.done.wait [#allocation4], 128  }
 0x12f   :  { %1101 = vsyncadd [#allocation4], 4294967168 }
 0x130   :  { %1024 = vsyncpa [#allocation3], 1 }
 0x131   :  { %1025 = vsyncpa [#allocation4], 1 }

</bundles_post_ra>
